<compile_context>
chip_gen: v7x
topology: tpu7x:2x2x1
jax: 0.10.0
libtpu: 0.0.40
codegen_flags: <defaults>
</compile_context>

<pallas_src>
import functools
import math

import jax
import jax.numpy as jnp
from jax import lax
from jax.experimental import pallas as pl
from jax.experimental.pallas import tpu as pltpu


def _round_up(x, m):
    return ((x + m - 1) // m) * m


def _vmem_limit(need_bytes):
    # Right-size the scoped VMEM limit from the actual block footprint, capped
    # below the physical VMEM of the current generation.
    try:
        phys = pltpu.get_tpu_info().vmem_capacity_bytes
    except Exception:
        phys = 64 * 1024 * 1024          # conservative (v7x) fallback
    cap = int(phys * 0.85)
    return int(min(max(int(need_bytes * 1.25) + (2 << 20), 32 << 20), cap))


# ---------------------------------------------------------------------------
# Pass 1: fused QKV projection over flattened (B*s_pad) rows.
#   grid = (n_m, n_k); K-dim (emb) tiled with an f32 accumulator so the weight
#   block stays (tk, total_pad) even for large emb.
# ---------------------------------------------------------------------------
def _qkv_proj_kernel(e_ref, wt_ref, q_ref, k_ref, v_ref, acc_ref, *, dk_pad, num_k):
    partial = jnp.dot(e_ref[...], wt_ref[...], preferred_element_type=jnp.float32)

    def _write(qkv):
        # Lane-aligned splits (dk_pad is a multiple of 128 -> no tile-crossing copies).
        q_ref[...] = qkv[:, :dk_pad].astype(q_ref.dtype)
        k_ref[...] = qkv[:, dk_pad:2 * dk_pad].astype(k_ref.dtype)
        v_ref[...] = qkv[:, 2 * dk_pad:].astype(v_ref.dtype)

    if num_k == 1:
        # Single K step: write outputs directly, skip the accumulator round trip.
        _write(partial)
    else:
        kk = pl.program_id(1)

        @pl.when(kk == 0)
        def _():
            acc_ref[...] = jnp.zeros_like(acc_ref)

        acc_ref[...] += partial

        @pl.when(kk == num_k - 1)
        def _():
            _write(acc_ref[...])


# ---------------------------------------------------------------------------
# Pass 2: flash-style attention with online softmax over kv tiles.
#   kv_resident=True  -> K/V blocks cover the whole padded sequence (fetched
#                        once per batch); the kv grid axis slices inside.
#   kv_resident=False -> per-kv-tile streaming blocks (large S fallback).
# ---------------------------------------------------------------------------
def _flash_attn_kernel(q_ref, k_ref, v_ref, o_ref, m_sc, l_sc, acc_sc, *,
                       scale, tkv, kv_resident, pad_rows):
    ki = pl.program_id(2)
    n_kv = pl.num_programs(2)

    @pl.when(ki == 0)
    def _():
        m_sc[...] = jnp.full_like(m_sc, -jnp.inf)
        l_sc[...] = jnp.zeros_like(l_sc)
        acc_sc[...] = jnp.zeros_like(acc_sc)

    q = q_ref[0]                                           # (tq,  dk_pad)
    if kv_resident:
        start = pl.multiple_of(ki * tkv, tkv)
        k = k_ref[0, pl.ds(start, tkv), :]                 # (tkv, dk_pad)
        v = v_ref[0, pl.ds(start, tkv), :]
    else:
        k = k_ref[0]
        v = v_ref[0]

    # scores: contract last dims directly (no materialized k.T / XLU transpose)
    s = lax.dot_general(q, k, (((1,), (1,)), ((), ())),
                        preferred_element_type=jnp.float32) * scale   # (tq, tkv)

    m_prev = m_sc[...]
    m_new = jnp.maximum(m_prev, s.max(axis=-1, keepdims=True))
    alpha = jnp.exp(m_prev - m_new)
    p = jnp.exp(s - m_new)                                  # f32 statistics

    row_sum = p.sum(axis=-1, keepdims=True)
    if pad_rows > 0:
        # Padded K rows are exactly zero (projection of zero-padded E rows), so
        # each padded column's score is exactly 0 and contributes exp(-m_new)
        # to the row sum and nothing to p @ V (matching V rows are zero too).
        # Subtract that closed-form term on the last kv tile instead of running
        # an iota/compare/select mask over (tq, tkv) on every step.
        pad_here = jnp.where(ki == n_kv - 1,
                             jnp.float32(pad_rows), jnp.float32(0.0))
        row_sum = row_sum - pad_here * jnp.exp(-m_new)

    l_sc[...] = alpha * l_sc[...] + row_sum
    acc_sc[...] = alpha * acc_sc[...] + jnp.dot(
        p.astype(v.dtype), v, preferred_element_type=jnp.float32)
    m_sc[...] = m_new

    @pl.when(ki == n_kv - 1)
    def _():
        # Exact divide (approx reciprocal removed per review; it runs once per
        # q tile so exactness is essentially free).
        o_ref[0] = (acc_sc[...] / l_sc[...]).astype(o_ref.dtype)


def self_att_head_level4(E, W_qkv, d_k):
    """Returns (out, (K, V)) matching SelfAttHeadLevel4.forward(E, use_cache=True)."""
    B, S, emb = E.shape
    assert W_qkv.shape == (2 * d_k + emb, emb)
    assert d_k <= emb, "out = scores @ V[..., :d_k] requires d_k <= emb_dim"
    dtype = E.dtype
    itemsize = jnp.dtype(dtype).itemsize
    scale = 1.0 / math.sqrt(d_k)

    # dtype-native sublane multiple: 8 (f32) / 16 (bf16) / 32 (int8, fp8)
    sub = max(8, 32 // itemsize)
    dk_pad = _round_up(d_k, 128)
    emb_pad = _round_up(emb, 128)
    total_pad = 2 * dk_pad + emb_pad

    # ---- sequence tiling ----
    tq = min(512, _round_up(S, sub))
    s_pad = _round_up(S, tq)
    n_q = s_pad // tq
    tkv = min(512, s_pad)                 # divides s_pad by construction
    n_kv = s_pad // tkv
    pad_rows = s_pad - S
    assert s_pad % tkv == 0 and pad_rows < tkv   # never a fully-padded kv tile

    # K/V residency: keep whole per-batch (padded) K and V resident in VMEM
    # across all q tiles when the double-buffered blocks fit the budget.
    kv_resident_bytes = 4 * s_pad * dk_pad * itemsize       # K + V, 2 buffers
    kv_resident = kv_resident_bytes <= 24 * 1024 * 1024

    # ---- projection tiling over flattened (B*s_pad) rows ----
    tm = tq                               # s_pad % tq == 0  ->  (B*s_pad) % tm == 0
    n_m = (B * s_pad) // tm
    tk = min(512, emb_pad)
    while emb_pad % tk != 0:              # 512 -> 256 -> 128 (128 always divides)
        tk //= 2
    n_k = emb_pad // tk

    # ---- wrapper-side layout work (skipped when already tile-aligned) ----
    if S == s_pad and emb == emb_pad:
        e2d = E.reshape(B * s_pad, emb_pad)
    else:
        e_pad = jnp.zeros((B, s_pad, emb_pad), dtype).at[:, :S, :emb].set(E)
        e2d = e_pad.reshape(B * s_pad, emb_pad)

    if d_k % 128 == 0 and emb % 128 == 0:
        wt = W_qkv.T                      # split points already lane-aligned
    else:
        wt = jnp.zeros((emb_pad, total_pad), dtype)
        wt = wt.at[:emb, :d_k].set(W_qkv[:d_k, :].T)
        wt = wt.at[:emb, dk_pad:dk_pad + d_k].set(W_qkv[d_k:2 * d_k, :].T)
        wt = wt.at[:emb, 2 * dk_pad:2 * dk_pad + emb].set(W_qkv[2 * d_k:, :].T)
    wt = wt.astype(dtype)

    # ------------------------- projection pass -------------------------
    proj_vmem = (2 * tm * tk * itemsize                       # E blocks
                 + 2 * tk * total_pad * itemsize              # weight blocks
                 + 2 * tm * (2 * dk_pad + emb_pad) * itemsize  # Q/K/V out blocks
                 + tm * total_pad * 4)                        # f32 accumulator
    proj_cost = pl.CostEstimate(
        flops=2 * B * s_pad * emb_pad * total_pad,
        transcendentals=0,
        bytes_accessed=itemsize * (B * s_pad * emb_pad
                                   + (1 if n_k == 1 else n_m) * emb_pad * total_pad
                                   + B * s_pad * total_pad),
    )
    q2d, k2d, v2d = pl.pallas_call(
        functools.partial(_qkv_proj_kernel, dk_pad=dk_pad, num_k=n_k),
        out_shape=(
            jax.ShapeDtypeStruct((B * s_pad, dk_pad), dtype),    # Q
            jax.ShapeDtypeStruct((B * s_pad, dk_pad), dtype),    # K (kv-cache)
            jax.ShapeDtypeStruct((B * s_pad, emb_pad), dtype),   # V (kv-cache)
        ),
        grid_spec=pltpu.PrefetchScalarGridSpec(
            num_scalar_prefetch=0,
            grid=(n_m, n_k),
            in_specs=[
                pl.BlockSpec((tm, tk), lambda i, kk: (i, kk)),
                pl.BlockSpec((tk, total_pad), lambda i, kk: (kk, 0)),
            ],
            out_specs=[
                pl.BlockSpec((tm, dk_pad), lambda i, kk: (i, 0)),
                pl.BlockSpec((tm, dk_pad), lambda i, kk: (i, 0)),
                pl.BlockSpec((tm, emb_pad), lambda i, kk: (i, 0)),
            ],
            scratch_shapes=[pltpu.VMEM((tm, total_pad), jnp.float32)],
        ),
        compiler_params=pltpu.CompilerParams(
            dimension_semantics=("parallel", "arbitrary"),
            vmem_limit_bytes=_vmem_limit(proj_vmem),
        ),
        cost_estimate=proj_cost,
    )(e2d, wt)

    q_pad = q2d.reshape(B, s_pad, dk_pad)
    k_pad = k2d.reshape(B, s_pad, dk_pad)
    v_pad = v2d.reshape(B, s_pad, emb_pad)

    # -------------------------- attention pass --------------------------
    if kv_resident:
        kv_spec = pl.BlockSpec((1, s_pad, dk_pad), lambda b, qi, ki: (b, 0, 0))
        kv_block_bytes = kv_resident_bytes
        kv_hbm_reads = 1
    else:
        kv_spec = pl.BlockSpec((1, tkv, dk_pad), lambda b, qi, ki: (b, ki, 0))
        kv_block_bytes = 4 * tkv * dk_pad * itemsize
        kv_hbm_reads = n_q

    attn_vmem = (2 * tq * dk_pad * itemsize        # Q blocks
                 + kv_block_bytes                  # K + V blocks
                 + 2 * tq * dk_pad * itemsize      # output blocks
                 + tq * (dk_pad + 2) * 4           # scratch (m, l, acc)
                 + 4 * tq * tkv * 4)               # s / p intermediates
    attn_cost = pl.CostEstimate(
        flops=4 * B * s_pad * s_pad * dk_pad,
        transcendentals=B * s_pad * s_pad,
        bytes_accessed=itemsize * (2 * B * s_pad * dk_pad              # Q read + out write
                                   + 2 * kv_hbm_reads * B * s_pad * dk_pad),  # K, V reads
    )
    out_pad = pl.pallas_call(
        functools.partial(_flash_attn_kernel, scale=scale, tkv=tkv,
                          kv_resident=kv_resident, pad_rows=pad_rows),
        out_shape=jax.ShapeDtypeStruct((B, s_pad, dk_pad), dtype),
        grid_spec=pltpu.PrefetchScalarGridSpec(
            num_scalar_prefetch=0,
            grid=(B, n_q, n_kv),
            in_specs=[
                pl.BlockSpec((1, tq, dk_pad), lambda b, qi, ki: (b, qi, 0)),
                kv_spec,
                # only the first dk_pad lanes of V feed the p @ V matmul
                kv_spec,
            ],
            out_specs=pl.BlockSpec((1, tq, dk_pad), lambda b, qi, ki: (b, qi, 0)),
            scratch_shapes=[
                pltpu.VMEM((tq, 1), jnp.float32),       # running max
                pltpu.VMEM((tq, 1), jnp.float32),       # running denom
                pltpu.VMEM((tq, dk_pad), jnp.float32),  # output accumulator
            ],
        ),
        compiler_params=pltpu.CompilerParams(
            dimension_semantics=("parallel", "parallel", "arbitrary"),
            vmem_limit_bytes=_vmem_limit(attn_vmem),
        ),
        cost_estimate=attn_cost,
    )(q_pad, k_pad, v_pad)

    # Trailing slices are no-ops (elided) when shapes are already aligned;
    # padded q rows are self-consistent but unused, so slicing is safe.
    out = out_pad[:, :S, :d_k]
    K = k_pad[:, :S, :d_k]
    V = v_pad[:, :S, :emb]
    return out, (K, V)


def _reference(E, W_qkv, d_k):
    qkv = jnp.einsum("bse,oe->bso", E, W_qkv)
    q = qkv[..., :d_k]
    k = qkv[..., d_k:2 * d_k]
    v = qkv[..., 2 * d_k:]
    scores = jnp.einsum("bqd,bkd->bqk", q, k) / math.sqrt(d_k)
    p = jax.nn.softmax(scores, axis=-1)
    out = jnp.einsum("bqk,bkd->bqd", p, v[..., :d_k])
    return out, k, v


if __name__ == "__main__":
    batch_size = 2
    seq_len = 5
    emb_dim = 8
    d_k = 4

    key = jax.random.PRNGKey(0)
    k_e, k_w = jax.random.split(key)
    E = jax.random.normal(k_e, (batch_size, seq_len, emb_dim), dtype=jnp.float32)
    # nn.Linear(emb_dim, 2*d_k + emb_dim, bias=False) weight: (2*d_k+emb, emb)
    bound = 1.0 / math.sqrt(emb_dim)
    W_qkv = jax.random.uniform(
        k_w, (2 * d_k + emb_dim, emb_dim), dtype=jnp.float32,
        minval=-bound, maxval=bound,
    )

    out, (K, V) = self_att_head_level4(E, W_qkv, d_k)
    jax.block_until_ready((out, K, V))

    ref_out, ref_k, ref_v = _reference(E, W_qkv, d_k)
    assert out.shape == (batch_size, seq_len, d_k)
    assert K.shape == (batch_size, seq_len, d_k)
    assert V.shape == (batch_size, seq_len, emb_dim)
    # Exact divide + f32 accumulation everywhere -> tight tolerances.
    assert jnp.allclose(out, ref_out, atol=1e-5, rtol=1e-5)
    assert jnp.allclose(K, ref_k, atol=1e-5, rtol=1e-5)
    assert jnp.allclose(V, ref_v, atol=1e-5, rtol=1e-5)

    print("KERNEL_OK")
</pallas_src>

<mosaic_0001>
module attributes {stable_mosaic.version = 11 : i64} {
  func.func @_qkv_proj_kernel(%arg0: i32, %arg1: i32, %arg2: memref<8x128xf32, #tpu.memory_space<vmem>>, %arg3: memref<128x384xf32, #tpu.memory_space<vmem>>, %arg4: memref<8x128xf32, #tpu.memory_space<vmem>>, %arg5: memref<8x128xf32, #tpu.memory_space<vmem>>, %arg6: memref<8x128xf32, #tpu.memory_space<vmem>>, %arg7: memref<8x384xf32, #tpu.memory_space<vmem>>) attributes {dimension_semantics = [#tpu.dimension_semantics<parallel>, #tpu.dimension_semantics<arbitrary>], iteration_bounds = array<i64: 2, 1>, scalar_prefetch = 0 : i64, scratch_operands = 1 : i64, tpu.core_type = #tpu.core_type<tc>, window_params = [{transform_indices = @transform_0, window_bounds = array<i64: 8, 128>}, {transform_indices = @transform_1, window_bounds = array<i64: 128, 384>}, {transform_indices = @transform_2, window_bounds = array<i64: 8, 128>}, {transform_indices = @transform_3, window_bounds = array<i64: 8, 128>}, {transform_indices = @transform_4, window_bounds = array<i64: 8, 128>}]} {
    %c0 = arith.constant 0 : index
    %c0_0 = arith.constant 0 : index
    %0 = vector.load %arg2[%c0, %c0_0] : memref<8x128xf32, #tpu.memory_space<vmem>>, vector<8x128xf32>
    %c0_1 = arith.constant 0 : index
    %c0_2 = arith.constant 0 : index
    %1 = vector.load %arg3[%c0_1, %c0_2] : memref<128x384xf32, #tpu.memory_space<vmem>>, vector<128x384xf32>
    %cst = arith.constant dense<0.000000e+00> : vector<8x384xf32>
    %2 = tpu.matmul %0, %1, %cst {dimension_numbers = #tpu.dot_dimension_numbers<[1], [0], [0], [1], [0, 0, 1, 1], [], []>} : vector<8x128xf32>, vector<128x384xf32>, vector<8x384xf32> -> vector<8x384xf32>
    %3 = vector.extract_strided_slice %2 {offsets = [0, 0], sizes = [8, 128], strides = [1, 1]} : vector<8x384xf32> to vector<8x128xf32>
    %c0_3 = arith.constant 0 : index
    %c0_4 = arith.constant 0 : index
    %4 = vector.load %arg4[%c0_3, %c0_4] : memref<8x128xf32, #tpu.memory_space<vmem>>, vector<8x128xf32>
    tpu.vector_store %arg4[%c0_3, %c0_4], %3 {strides = array<i32>} : memref<8x128xf32, #tpu.memory_space<vmem>>, vector<8x128xf32>,
    %5 = vector.extract_strided_slice %2 {offsets = [0, 128], sizes = [8, 128], strides = [1, 1]} : vector<8x384xf32> to vector<8x128xf32>
    %c0_5 = arith.constant 0 : index
    %c0_6 = arith.constant 0 : index
    %6 = vector.load %arg5[%c0_5, %c0_6] : memref<8x128xf32, #tpu.memory_space<vmem>>, vector<8x128xf32>
    tpu.vector_store %arg5[%c0_5, %c0_6], %5 {strides = array<i32>} : memref<8x128xf32, #tpu.memory_space<vmem>>, vector<8x128xf32>,
    %7 = vector.extract_strided_slice %2 {offsets = [0, 256], sizes = [8, 128], strides = [1, 1]} : vector<8x384xf32> to vector<8x128xf32>
    %c0_7 = arith.constant 0 : index
    %c0_8 = arith.constant 0 : index
    %8 = vector.load %arg6[%c0_7, %c0_8] : memref<8x128xf32, #tpu.memory_space<vmem>>, vector<8x128xf32>
    tpu.vector_store %arg6[%c0_7, %c0_8], %7 {strides = array<i32>} : memref<8x128xf32, #tpu.memory_space<vmem>>, vector<8x128xf32>,
    return
  }
  func.func @transform_0(%arg0: i32, %arg1: i32) -> (i32, i32) {
    %c0_i32 = arith.constant 0 : i32
    return %arg0, %arg1 : i32, i32
  }
  func.func @transform_1(%arg0: i32, %arg1: i32) -> (i32, i32) {
    %c0_i32 = arith.constant 0 : i32
    %c0_i32_0 = arith.constant 0 : i32
    return %arg1, %c0_i32 : i32, i32
  }
  func.func @transform_2(%arg0: i32, %arg1: i32) -> (i32, i32) {
    %c0_i32 = arith.constant 0 : i32
    %c0_i32_0 = arith.constant 0 : i32
    return %arg0, %c0_i32 : i32, i32
  }
  func.func @transform_3(%arg0: i32, %arg1: i32) -> (i32, i32) {
    %c0_i32 = arith.constant 0 : i32
    %c0_i32_0 = arith.constant 0 : i32
    return %arg0, %c0_i32 : i32, i32
  }
  func.func @transform_4(%arg0: i32, %arg1: i32) -> (i32, i32) {
    %c0_i32 = arith.constant 0 : i32
    %c0_i32_0 = arith.constant 0 : i32
    return %arg0, %c0_i32 : i32, i32
  }
}

</mosaic_0001>

<bundles_post_ra>
// kernel: tpu_custom_call.1
= control target key start
LH: loop header
LB: loop body
LE: loop exit
PB: predicated region body
PF: predicated region fallthrough
CT: control target
= control target key end

     0   :  { %s1417_s0 = inlined_call_operand.hbm [shape: f32[16,128], index: 0, kind: input, shape index: {}]   ;;  %s1418_s1 = inlined_call_operand.hbm [shape: f32[128,384], index: 1, kind: input, shape index: {}]   ;;  %s1419_s2 = inlined_call_operand.hbm [shape: f32[16,128], index: 2, kind: output, shape index: {0}]   ;;  %s1420_s3 = inlined_call_operand.hbm [shape: f32[16,128], index: 3, kind: output, shape index: {1}]   ;;  %s1421_s4 = inlined_call_operand.hbm [shape: f32[16,128], index: 4, kind: output, shape index: {2}]  }
   0x1   :  { %1426 = sst [smem:[#allocation16_spill]] %s1417_s0 }
   0x2   :  { %10 = vsyncpa [#allocation4], 0 }
   0x3   :  { %12 = vsyncpa [#allocation4 + $0x1], 0 }
   0x4   :  { %13 = vsyncpa [#allocation7], 0 }
   0x5   :  { %14 = vsyncpa [#allocation5], 0 }
   0x6   :  { %16 = vsyncpa [#allocation5 + $0x1], 0 }
   0x7   :  { %17 = vsyncpa [#allocation10], 0 }
   0x8   :  { %19 = vsyncpa [#allocation10 + $0x1], 0  ;;  %s1124_s15 = smov 0   ;;  %s1126_s16 = smov 0  }
   0x9   :  { %s1128_s17 = smov 0   ;;  %s1130_s18 = smov 0  }
   0xa   :  { %s1132_s19 = smov 0   ;;  %s1134_s20 = smov 0  }
   0xb LB: > { %s1155_s21 = sadd.s32 4294967295, %s1087_s20   ;;  %s1425_s22 = sadd.s32 4294967294, %s1087_s20   ;;  %s1087_s20 = sphi %s1134_s20, %s25_s20   ;;  %s1083_s19 = sphi %s1132_s19, %s1448_s19   ;;  %s1079_s18 = sphi %s1130_s18, %s1447_s18   ;;  %s1075_s17 = sphi %s1128_s17, %s1446_s17   ;;  %s1071_s16 = sphi %s1126_s16, %s1445_s16   ;;  %s1067_s15 = sphi %s1124_s15, %s1444_s15  }
   0xc   : > { %p59_p0 = scmp.ne.s32.totalorder %s1071_s16, %s1067_s15  ;;  %p1422_p1 = scmp.eq.s32.totalorder %s1155_s21, 0 }
   0xd   : > { %p115_p3 = scmp.eq.s32.totalorder %s1425_s22, 1  ;;  %p668_p5 = scmp.ge.s32.totalorder %s1087_s20, 1 }
   0xe   : > { %p1166_p4 = por %p1422_p1, %p59_p0  ;;  %p174_p7 = scmp.lt.s32.totalorder %s1087_s20, 3 }
   0xf   : > { %p1171_p6 = por %p115_p3, %p59_p0  ;;  %s1089_s26 = smov [#allocation6]  }
  0x10   : > { %s1427_s23 = scalar_select %p1166_p4, 1, 0 }
  0x11   : > { %s1428_s24 = scalar_select %p1171_p6, 1, 0 }
  0x12   : > { %p1176_p8 = pnand %p668_p5, %p174_p7  ;;  %s190_s27 = sshll.u32 %s1089_s26, 4  ;;  %s191_s27 = int_to_ptr.vmem [resolvable:$true] %s190_s27 }
  0x13   : > { %s37_s29 = sadd.s32 1, %s1083_s19  ;;  %s883_s6 = scalar_lea.hbm %s1418_s1, 6144 }
  0x14   : > { %s1429_s25 = scalar_select %p1176_p8, 1, 0 }
  0x15   : > { %p807_p9 = pneg %p1176_p8  ;;  %p884_p12 = scmp.ne.s32.totalorder %s1418_s1, %s883_s6 }
  0x16   : > { %p890_p5 = scmp.lt.u32.totalorder %s883_s6, %s1418_s1 }
  0x17   : > { %p1185_p11 = pnand %p807_p9, %p1422_p1 }
  0x19   : > { %p885_p13 = pneg %p1185_p11 }
  0x1b   : > { %p886_p0 = pnand %p885_p13, %p884_p12 }
  0x1d   : > { %p887_p3 = pneg %p886_p0 }
  0x1f   : > { %p892_p7 = pnand %p890_p5, %p887_p3 }
  0x21   : > { %895 = shalt.err (!%p892_p7)
}
  0x22   : > { %s896_s11 = scalar_lea.vmem %s191_s27, 6144  ;;  %p904_p2 = scmp.lt.s32.totalorder %s191_s27, %s191_s27 }
  0x23   : > { %p897_p9 = scmp.ne.s32.totalorder %s191_s27, %s896_s11  ;;  %p905_p6 = scmp.lt.s32.totalorder %s896_s11, %s896_s11 }
  0x25   : > { %p899_p10 = pnand %p897_p9, %p885_p13  ;;  %p906_p4 = por %p905_p6, %p904_p2 }
  0x27   : > { %p900_p1 = pneg %p899_p10 }
  0x29   : > { %p907_p8 = pnand %p906_p4, %p900_p1 }
  0x2b   : > { %910 = shalt.err (!%p907_p8)
}
  0x2c   : > { %s1090_s12 = smov 384   ;;  %s1091_s13 = smov 24  }
  0x2d   : > { %810 = dma.hbm_to_vmem [thread:$0]  (!%p1185_p11), %s1418_s1, 6144, %s191_s27, [#allocation7], %s1090_s12, %s1090_s12, %s1091_s13  }
  0x2e   : > { %p39_p1 = scmp.ge.s32.totalorder %s37_s29, 2  ;;  %s46_s30 = sadd.s32 1, %s1075_s17 }
  0x2f   : > { %p53_p2 = scmp.ne.s32.totalorder %s1075_s17, %s1071_s16  ;;  %p54_p4 = scmp.eq.s32.totalorder %s1087_s20, 0 }
  0x30   : > { %s1450_s29 = smov (%p39_p1, %s37_s29), 0  ;;  %p1432_p8 = scmp.eq.s32.totalorder %s1155_s21, 1 }
  0x31   : > { %p1212_p6 = por %p54_p4, %p53_p2  ;;  %s41_s28 = ssub.s32 %s1083_s19, %s1450_s29 }
  0x32   : > { %p1218_p10 = por %p1432_p8, %p53_p2  ;;  %p826_p12 = scmp.lt.s32.totalorder %s1087_s20, 2 }
  0x33   : > { %p44_p11 = scmp.eq.s32.totalorder %s41_s28, 0  ;;  %s204_s27 = sand.u32 1, %s1075_s17  }
  0x34   : > { %s671_s7 = sshll.u32 %s204_s27, 3  ;;  %s672_s9 = sshll.u32 %s1083_s19, 7 }
  0x35   : > { %s1227_s8 = scalar_select %p44_p11, %s1075_s17, %s46_s30  }
  0x36   : > { %s1434_s0 = sld [smem:[#allocation16_spill]]  ;;  %s208_s13 = scalar_lea.vmem [#allocation3], %s671_s7 }
  0x37   : > { %s216_s14 = sshll.u32 %s208_s13, 4  ;;  %p1239_p13 = pnand %p826_p12, %p1212_p6  ;;  %s1235_s14 = int_to_ptr.vmem [resolvable:$true] %s216_s14 }
  0x38   : > { %s205_s30 = scalar_lea.sflag [#allocation4], %s204_s27 }
  0x39   : > { %p913_p3 = pneg %p1239_p13 }
  0x3c   : > { %s1233_s12 = scalar_lea.hbm %s1434_s0, %s672_s9  ;;  %s916_s10 = scalar_lea.hbm %s1434_s0, 256 }
  0x3d   : > { %s911_s28 = scalar_lea.hbm %s1233_s12, 128  ;;  %p917_p9 = scmp.lt.u32.totalorder %s1233_s12, %s1434_s0 }
  0x3e   : > { %p912_p0 = scmp.ne.s32.totalorder %s1233_s12, %s911_s28  ;;  %p918_p1 = scmp.lt.u32.totalorder %s916_s10, %s911_s28 }
  0x3f   : > { %p920_p4 = scmp.lt.u32.totalorder %s911_s28, %s1233_s12 }
  0x40   : > { %p914_p5 = pnand %p913_p3, %p912_p0  ;;  %p919_p2 = por %p918_p1, %p917_p9 }
  0x42   : > { %p915_p7 = pneg %p914_p5  ;;  %p921_p6 = por %p920_p4, %p919_p2 }
  0x44   : > { %p922_p8 = pnand %p921_p6, %p915_p7 }
  0x46   : > { %925 = shalt.err (!%p922_p8)
}
  0x47   : > { %s926_s27 = scalar_lea.vmem %s1235_s14, 128  ;;  %s1092_s13 = smov [#allocation3]  }
  0x48   : > { %p927_p12 = scmp.ne.s32.totalorder %s1235_s14, %s926_s27  ;;  %s931_s7 = sshll.u32 %s1092_s13, 4  ;;  %s932_s7 = int_to_ptr.vmem [resolvable:$false] %s931_s7 }
  0x49   : > { %s933_s9 = scalar_lea.vmem %s932_s7, 256  ;;  %p934_p5 = scmp.lt.s32.totalorder %s1235_s14, %s932_s7 }
  0x4a   : > { %p929_p11 = pnand %p927_p12, %p913_p3  ;;  %p935_p9 = scmp.lt.s32.totalorder %s933_s9, %s926_s27 }
  0x4c   : > { %p930_p0 = pneg %p929_p11  ;;  %p936_p1 = por %p935_p9, %p934_p5 }
  0x4e   : > { %p937_p2 = pnand %p936_p1, %p930_p0 }
  0x50   : > { %940 = shalt.err (!%p937_p2)
}
  0x51   : > { %814 = dma.hbm_to_vmem [thread:$0]  (!%p1239_p13), %s1233_s12, 128, %s1235_s14, %s205_s30  }
  0x52   : > { %p1436_p7 = scmp.ne.s32.totalorder %s1429_s25, 0 }
  0x53   : > { %s1271_s28 = sand.u32 (!%p1436_p7), 1, %s1071_s16   ;;  %p1437_p3 = scmp.ne.s32.totalorder (!%p1436_p7), %s1427_s23, 0 }
  0x54   : > { %225 = sbr.rel (%p1436_p7) target bundleno = 409 (0x199), region = 28  ;;  %s1274_s10 = sshll.u32 (!%p1436_p7), %s1271_s28, 3 }
  0x55   : > { %s228_s5 = scalar_lea.sflag (!%p1436_p7), [#allocation4], %s1271_s28  ;;  %s231_s11 = scalar_lea.vmem (!%p1436_p7), [#allocation3], %s1274_s10 }
  0x5b   : > { %1050 = dma.done.wait (%p1437_p3), %s228_s5, 128  }
  0x5c   : > { %1052 = vsyncadd (%p1437_p3), %s228_s5, 4294967168  ;;  %p1438_p13 = scmp.eq.s32.totalorder %s1155_s21, 0 }
  0x5e   : > { %1054 = dma.done.wait (%p1438_p13), [#allocation7], 6144   ;;  %p1439_p4 = pmov %p1438_p13 }
  0x5f   : > { %v1093_v0 = vmov 0.0|0.0   ;;  %v1094_v1 = vmov 0.0   ;;  %vm1095_vm0 = vmmov 0   ;;  %v273_v2 = vld [vmem:[#allocation6 + $0x8] sm:$0xff]  ;;  %v276_v3 = vld [vmem:[#allocation6 + $0x20] sm:$0xff]  ;;  %v275_v6 = vld [vmem:[#allocation6 + $0x18] sm:$0xff] }
  0x60   : > { %1056 = vsyncadd (%p1439_p4), [#allocation7], 4294961152  ;;  %771 = vmatprep.subr.bf16.mxu1 %v1093_v0  ;;  %384 = vmatprep.mubr.f32.mxu0 %v1094_v1  ;;  %v272_v4 = vld [vmem:[#allocation6] sm:$0xff]  ;;  %v739_v5 = vpack.c.bf16 %v276_v3, %v273_v2  ;;  %v274_v7 = vld [vmem:[#allocation6 + $0x10] sm:$0xff]  ;;  %s255_s23 = scalar_lea.vmem [#allocation8], %s1274_s10  ;;  %s262_s12 = scalar_lea.vmem [#allocation9], %s1274_s10 }
  0x61   : > { %736 = vmatprep.mubr.msk.f32.mxu1 %vm1095_vm0, %v1094_v1  ;;  %v277_v8 = vld [vmem:[#allocation6 + $0x28] sm:$0xff]  ;;  %v741_v9 = vpack.c.bf16 %v275_v6, %v272_v4  ;;  %v279_v11 = vld [vmem:[#allocation6 + $0x38] sm:$0xff]  ;;  %v282_v12 = vld [vmem:[#allocation6 + $0x50] sm:$0xff]  ;;  %s488_s25 = sshll.u32 %s255_s23, 4  ;;  %s501_s14 = sshll.u32 %s262_s12, 4  ;;  %s1299_s25 = int_to_ptr.vmem [resolvable:$true] %s488_s25  ;;  %s1302_s14 = int_to_ptr.vmem [resolvable:$true] %s501_s14 }
  0x62   : > { %v772_v10 = vpack.c.bf16 %v277_v8, %v274_v7  ;;  %v278_v13 = vld [vmem:[#allocation6 + $0x30] sm:$0xff]  ;;  %740 = vmatprep.subr.bf16.mxu0 %v739_v5  ;;  %v743_v14 = vpack.c.bf16 %v282_v12, %v279_v11  ;;  %v281_v15 = vld [vmem:[#allocation6 + $0x48] sm:$0xff]  ;;  %v280_v16 = vld [vmem:[#allocation6 + $0x40] sm:$0xff]  ;;  %s682_s26 = sshll.u32 %s1079_s18, 7  ;;  %s269_s27 = scalar_lea.vmem [#allocation11], %s1274_s10 }
  0x63   : > { %v283_v17 = vld [vmem:[#allocation6 + $0x58] sm:$0xff]  ;;  %742 = vmatpush1.bf16.msra.mxu0 %v741_v9  ;;  %v745_v18 = vpack.c.bf16 %v281_v15, %v278_v13  ;;  %v285_v20 = vld [vmem:[#allocation6 + $0x68] sm:$0xff]  ;;  %v288_v21 = vld [vmem:[#allocation6 + $0x80] sm:$0xff]  ;;  %s514_s13 = sshll.u32 %s269_s27, 4  ;;  %s1308_s5 = scalar_lea.hbm %s1419_s2, %s682_s26  ;;  %s1315_s13 = int_to_ptr.vmem [resolvable:$true] %s514_s13 }
  0x64   : > { %773 = vmatpush3.bf16.msra.mxu1 %v772_v10  ;;  %v775_v19 = vpack.c.bf16 %v283_v17, %v280_v16  ;;  %v284_v22 = vld [vmem:[#allocation6 + $0x60] sm:$0xff]  ;;  %744 = vmatprep.subr.bf16.mxu0 %v743_v14  ;;  %v747_v23 = vpack.c.bf16 %v288_v21, %v285_v20  ;;  %v287_v24 = vld [vmem:[#allocation6 + $0x78] sm:$0xff]  ;;  %v286_v25 = vld [vmem:[#allocation6 + $0x70] sm:$0xff]  ;;  %s1313_s22 = scalar_lea.hbm %s1420_s3, %s682_s26  ;;  %s1320_s7 = scalar_lea.hbm %s1421_s4, %s682_s26 }
  0x65   : > { %774 = vmatprep.subr.bf16.mxu1 %v1093_v0  ;;  %v289_v26 = vld [vmem:[#allocation6 + $0x88] sm:$0xff]  ;;  %v291_v27 = vld [vmem:[#allocation6 + $0x98] sm:$0xff]  ;;  %v294_v28 = vld [vmem:[#allocation6 + $0xb0] sm:$0xff]  ;;  %v749_v29 = vpack.c.bf16 %v287_v24, %v284_v22  ;;  %s465_s9 = scalar_lea.sflag [#allocation5], %s1271_s28  ;;  %s941_s0 = scalar_lea.vmem %s1299_s25, 128 }
  0x66   : > { %v778_v30 = vpack.c.bf16 %v289_v26, %v286_v25  ;;  %v290_v31 = vld [vmem:[#allocation6 + $0x90] sm:$0xff]  ;;  %v751_v32 = vpack.c.bf16 %v294_v28, %v291_v27  ;;  %v293_v33 = vld [vmem:[#allocation6 + $0xa8] sm:$0xff]  ;;  %v292_v34 = vld [vmem:[#allocation6 + $0xa0] sm:$0xff]  ;;  %p942_p6 = scmp.ne.s32.totalorder %s1299_s25, %s941_s0 }
  0x67   : > { %746 = vmatpush1.bf16.msra.mxu0 %v745_v18  ;;  %v295_v35 = vld [vmem:[#allocation6 + $0xb8] sm:$0xff]  ;;  %v297_v36 = vld [vmem:[#allocation6 + $0xc8] sm:$0xff]  ;;  %v300_v37 = vld [vmem:[#allocation6 + $0xe0] sm:$0xff]  ;;  %v753_v38 = vpack.c.bf16 %v293_v33, %v290_v31 }
  0x68   : > { %776 = vmatpush3.bf16.msra.mxu1 %v775_v19  ;;  %748 = vmatprep.subr.bf16.mxu0 %v747_v23  ;;  %v781_v39 = vpack.c.bf16 %v295_v35, %v292_v34  ;;  %v296_v40 = vld [vmem:[#allocation6 + $0xc0] sm:$0xff]  ;;  %v755_v41 = vpack.c.bf16 %v300_v37, %v297_v36  ;;  %v299_v42 = vld [vmem:[#allocation6 + $0xd8] sm:$0xff]  ;;  %v298_v43 = vld [vmem:[#allocation6 + $0xd0] sm:$0xff]  ;;  %p943_p8 = pnand %p942_p6, %p1218_p10 }
  0x69   : > { %777 = vmatprep.subr.bf16.mxu1 %v1093_v0  ;;  %v301_v44 = vld [vmem:[#allocation6 + $0xe8] sm:$0xff]  ;;  %v303_v45 = vld [vmem:[#allocation6 + $0xf8] sm:$0xff]  ;;  %v306_v46 = vld [vmem:[#allocation6 + $0x110] sm:$0xff]  ;;  %v757_v47 = vpack.c.bf16 %v299_v42, %v296_v40 }
  0x6a   : > { %v784_v48 = vpack.c.bf16 %v301_v44, %v298_v43  ;;  %v302_v49 = vld [vmem:[#allocation6 + $0xf0] sm:$0xff]  ;;  %v759_v50 = vpack.c.bf16 %v306_v46, %v303_v45  ;;  %v305_v51 = vld [vmem:[#allocation6 + $0x108] sm:$0xff]  ;;  %v304_v52 = vld [vmem:[#allocation6 + $0x100] sm:$0xff]  ;;  %p944_p12 = pneg %p943_p8 }
  0x6b   : > { %750 = vmatpush1.bf16.msra.mxu0 %v749_v29  ;;  %v307_v53 = vld [vmem:[#allocation6 + $0x118] sm:$0xff]  ;;  %v309_v54 = vld [vmem:[#allocation6 + $0x128] sm:$0xff]  ;;  %v312_v55 = vld [vmem:[#allocation6 + $0x140] sm:$0xff]  ;;  %v761_v56 = vpack.c.bf16 %v305_v51, %v302_v49 }
  0x6c   : > { %779 = vmatpush3.bf16.msra.mxu1 %v778_v30  ;;  %752 = vmatprep.subr.bf16.mxu0 %v751_v32  ;;  %v787_v57 = vpack.c.bf16 %v307_v53, %v304_v52  ;;  %v308_v58 = vld [vmem:[#allocation6 + $0x120] sm:$0xff]  ;;  %v763_v59 = vpack.c.bf16 %v312_v55, %v309_v54  ;;  %v311_v60 = vld [vmem:[#allocation6 + $0x138] sm:$0xff]  ;;  %v310_v61 = vld [vmem:[#allocation6 + $0x130] sm:$0xff] }
  0x6d   : > { %780 = vmatprep.subr.bf16.mxu1 %v1093_v0  ;;  %v313_v62 = vld [vmem:[#allocation6 + $0x148] sm:$0xff]  ;;  %v315_v63 = vld [vmem:[#allocation6 + $0x158] sm:$0xff]  ;;  %v318_v1 = vld [vmem:[#allocation6 + $0x170] sm:$0xff]  ;;  %v765_v2 = vpack.c.bf16 %v311_v60, %v308_v58 }
  0x6e   : > { %v790_v3 = vpack.c.bf16 %v313_v62, %v310_v61  ;;  %v314_v4 = vld [vmem:[#allocation6 + $0x150] sm:$0xff]  ;;  %v767_v5 = vpack.c.bf16 %v318_v1, %v315_v63  ;;  %v317_v6 = vld [vmem:[#allocation6 + $0x168] sm:$0xff]  ;;  %v316_v7 = vld [vmem:[#allocation6 + $0x160] sm:$0xff] }
  0x6f   : > { %754 = vmatpush1.bf16.msra.mxu0 %v753_v38  ;;  %v319_v8 = vld [vmem:[#allocation6 + $0x178] sm:$0xff]  ;;  %v769_v9 = vpack.c.bf16 %v317_v6, %v314_v4 }
  0x70   : > { %782 = vmatpush3.bf16.msra.mxu1 %v781_v39  ;;  %756 = vmatprep.subr.bf16.mxu0 %v755_v41  ;;  %v793_v10 = vpack.c.bf16 %v319_v8, %v316_v7  ;;  %v271_v11 = vld [vmem:[%s231_s11] sm:$0xff]  ;;  %s1096_s11 = smov [#allocation8]  }
  0x71   : > { %783 = vmatprep.subr.bf16.mxu1 %v1093_v0 }
  0x73   : > { %758 = vmatpush1.bf16.msra.mxu0 %v757_v47 }
  0x74   : > { %785 = vmatpush3.bf16.msra.mxu1 %v784_v48  ;;  %760 = vmatprep.subr.bf16.mxu0 %v759_v50 }
  0x75   : > { %786 = vmatprep.subr.bf16.mxu1 %v1093_v0 }
  0x77   : > { %762 = vmatpush1.bf16.msra.mxu0 %v761_v56 }
  0x78   : > { %788 = vmatpush3.bf16.msra.mxu1 %v787_v57  ;;  %764 = vmatprep.subr.bf16.mxu0 %v763_v59 }
  0x79   : > { %789 = vmatprep.subr.bf16.mxu1 %v1093_v0 }
  0x7b   : > { %766 = vmatpush1.bf16.msra.mxu0 %v765_v2 }
  0x7c   : > { %791 = vmatpush3.bf16.msra.mxu1 %v790_v3  ;;  %768 = vmatprep.subr.bf16.mxu0 %v767_v5 }
  0x7d   : > { %792 = vmatprep.subr.bf16.mxu1 %v1093_v0 }
  0x7f   : > { %770 = vmatpush1.bf16.msra.mxu0 %v769_v9 }
  0x80   : > { %794 = vmatpush3.bf16.msra.mxu1 %v793_v10 }
  0x82   : > { %385 = vmatmul.mubr.f32.vlgmr.msra.gmra.mrb[0].mxu0 %v271_v11 }
  0x83   : > { %737 = vmatmul.mubr.f32.vlgmr.msra.gmra.mrb[0].mxu1 %v271_v11 }
 0x155   : > { %v386_v0 = vpop.f32.mrb[0].mxu0 }
 0x156   : > { %v457_v12 = vpop.f32.mrb[0].mxu1  ;;  %461 = vst [vmem:[%s255_s23] sm:$0xff] %v386_v0  ;;  %v388_v13 = vpop.f32.mrb[1].mxu0  ;;  %s945_s23 = sshll.u32 %s1096_s11, 4  ;;  %s946_s23 = int_to_ptr.vmem [resolvable:$false] %s945_s23 }
 0x157   : > { %463 = vst [vmem:[%s269_s27] sm:$0xff] %v457_v12  ;;  %v738_v14 = vpop.f32.mrb[1].mxu1  ;;  %462 = vst [vmem:[%s262_s12] sm:$0xff] %v388_v13  ;;  %s947_s18 = scalar_lea.vmem %s946_s23, 256  ;;  %p948_p11 = scmp.lt.s32.totalorder %s1299_s25, %s946_s23 }
 0x158   : > { %p949_p0 = scmp.lt.s32.totalorder %s947_s18, %s941_s0 }
 0x15a   : > { %p950_p5 = por %p949_p0, %p948_p11 }
 0x15c   : > { %p951_p9 = pnand %p950_p5, %p944_p12 }
 0x15e   : > { %954 = shalt.err (!%p951_p9)
}
 0x15f   : > { %s955_s28 = scalar_lea.hbm %s1308_s5, 128  ;;  %s959_s30 = scalar_lea.hbm %s1419_s2, 256 }
 0x160   : > { %p956_p1 = scmp.ne.s32.totalorder %s1308_s5, %s955_s28  ;;  %p960_p3 = scmp.lt.u32.totalorder %s1308_s5, %s1419_s2 }
 0x161   : > { %p961_p13 = scmp.lt.u32.totalorder %s959_s30, %s955_s28  ;;  %p963_p6 = scmp.lt.u32.totalorder %s955_s28, %s1308_s5 }
 0x162   : > { %p957_p2 = pnand %p956_p1, %p1218_p10 }
 0x163   : > { %p962_p4 = por %p961_p13, %p960_p3 }
 0x164   : > { %p958_p7 = pneg %p957_p2 }
 0x165   : > { %p964_p8 = por %p963_p6, %p962_p4 }
 0x167   : > { %p965_p12 = pnand %p964_p8, %p958_p7 }
 0x169   : > { %968 = shalt.err (!%p965_p12)
}
 0x16a   : > { %801 = dma.vmem_to_hbm [thread:$0]  (%p1218_p10), %s1299_s25, 128, %s1308_s5, %s465_s9  }
 0x16b   : > { %s1440_s0 = sand.u32 1, %s1155_s21   ;;  %s969_s23 = scalar_lea.vmem %s1302_s14, 128 }
 0x16c   : > { %s1346_s11 = scalar_lea.sflag [#allocation10], %s1440_s0  ;;  %p970_p11 = scmp.ne.s32.totalorder %s1302_s14, %s969_s23 }
 0x16d   : > { %s1097_s18 = smov [#allocation9]  }
 0x16e   : > { %p971_p0 = pnand %p970_p11, %p1218_p10  ;;  %s973_s28 = sshll.u32 %s1097_s18, 4  ;;  %s974_s28 = int_to_ptr.vmem [resolvable:$false] %s973_s28 }
 0x16f   : > { %s975_s12 = scalar_lea.vmem %s974_s28, 256  ;;  %p976_p9 = scmp.lt.s32.totalorder %s1302_s14, %s974_s28 }
 0x170   : > { %p972_p5 = pneg %p971_p0  ;;  %p977_p1 = scmp.lt.s32.totalorder %s975_s12, %s969_s23 }
 0x172   : > { %p978_p2 = por %p977_p1, %p976_p9 }
 0x174   : > { %p979_p7 = pnand %p978_p2, %p972_p5 }
 0x176   : > { %982 = shalt.err (!%p979_p7)
}
 0x177   : > { %s983_s21 = scalar_lea.hbm %s1313_s22, 128  ;;  %s987_s9 = scalar_lea.hbm %s1420_s3, 256 }
 0x178   : > { %p984_p3 = scmp.ne.s32.totalorder %s1313_s22, %s983_s21  ;;  %p988_p6 = scmp.lt.u32.totalorder %s1313_s22, %s1420_s3 }
 0x179   : > { %p989_p8 = scmp.lt.u32.totalorder %s987_s9, %s983_s21  ;;  %p991_p11 = scmp.lt.u32.totalorder %s983_s21, %s1313_s22 }
 0x17a   : > { %p985_p13 = pnand %p984_p3, %p1218_p10 }
 0x17b   : > { %p990_p12 = por %p989_p8, %p988_p6 }
 0x17c   : > { %p986_p4 = pneg %p985_p13 }
 0x17d   : > { %p992_p0 = por %p991_p11, %p990_p12 }
 0x17f   : > { %p993_p5 = pnand %p992_p0, %p986_p4 }
 0x181   : > { %996 = shalt.err (!%p993_p5)
}
 0x182   : > { %802 = dma.vmem_to_hbm [thread:$0]  (%p1218_p10), %s1302_s14, 128, %s1313_s22, %s1346_s11  }
 0x183   : > { %s997_s27 = scalar_lea.vmem %s1315_s13, 128  ;;  %s1098_s10 = smov [#allocation11]  }
 0x184   : > { %p998_p9 = scmp.ne.s32.totalorder %s1315_s13, %s997_s27  ;;  %s1001_s0 = sshll.u32 %s1098_s10, 4  ;;  %s1002_s0 = int_to_ptr.vmem [resolvable:$false] %s1001_s0 }
 0x185   : > { %s1003_s23 = scalar_lea.vmem %s1002_s0, 256  ;;  %p1004_p7 = scmp.lt.s32.totalorder %s1315_s13, %s1002_s0 }
 0x186   : > { %p999_p1 = pnand %p998_p9, %p1218_p10  ;;  %p1005_p3 = scmp.lt.s32.totalorder %s1003_s23, %s997_s27 }
 0x188   : > { %p1000_p2 = pneg %p999_p1  ;;  %p1006_p13 = por %p1005_p3, %p1004_p7 }
 0x18a   : > { %p1007_p4 = pnand %p1006_p13, %p1000_p2 }
 0x18c   : > { %1010 = shalt.err (!%p1007_p4)
}
 0x18d   : > { %s1011_s22 = scalar_lea.hbm %s1320_s7, 128  ;;  %s1015_s28 = scalar_lea.hbm %s1421_s4, 256 }
 0x18e   : > { %p1012_p6 = scmp.ne.s32.totalorder %s1320_s7, %s1011_s22  ;;  %p1016_p11 = scmp.lt.u32.totalorder %s1320_s7, %s1421_s4 }
 0x18f   : > { %p1017_p0 = scmp.lt.u32.totalorder %s1015_s28, %s1011_s22  ;;  %p1019_p9 = scmp.lt.u32.totalorder %s1011_s22, %s1320_s7 }
 0x190   : > { %p1013_p8 = pnand %p1012_p6, %p1218_p10 }
 0x191   : > { %p1018_p5 = por %p1017_p0, %p1016_p11 }
 0x192   : > { %p1014_p12 = pneg %p1013_p8 }
 0x193   : > { %p1020_p1 = por %p1019_p9, %p1018_p5 }
 0x195   : > { %p1021_p2 = pnand %p1020_p1, %p1014_p12 }
 0x197   : > { %1024 = shalt.err (!%p1021_p2)
}
 0x198   : > { %803 = dma.vmem_to_hbm [thread:$0]  (%p1218_p10), %s1315_s13, 128, %s1320_s7, %s1346_s11  }
 0x199 PF: > { %s526_s25 = sand.u32 1, %s1067_s15   ;;  %p1441_p7 = scmp.ne.s32.totalorder %s1428_s24, 0 }
 0x19a   : > { %p1442_p3 = scmp.ge.s32.totalorder %s1087_s20, 2  ;;  %s527_s5 = scalar_lea.sflag [#allocation5], %s526_s25 }
 0x19c   : > { %p816_p13 = pnand %p1442_p3, %p1441_p7 }
 0x19e   : > { %1058 = dma.done.wait (!%p816_p13), %s527_s5, 128  }
 0x19f   : > { %1060 = vsyncadd (!%p816_p13), %s527_s5, 4294967168  ;;  %s1443_s9 = sadd.s32 4294967294, %s1087_s20  }
 0x1a0   : > { %s535_s26 = sand.u32 1, %s1443_s9  }
 0x1a1   : > { %s536_s30 = scalar_lea.sflag [#allocation10], %s535_s26 }
 0x1a2   : > { %1062 = dma.done.wait (!%p816_p13), %s536_s30, 256  }
 0x1a3   : > { %1064 = vsyncadd (!%p816_p13), %s536_s30, 4294967040  ;;  %s25_s20 = sadd.s32 1, %s1087_s20   ;;  %s1444_s15 = smov %s1071_s16 }
 0x1a4   : > { %p22_p10 = scmp.ge.s32.totalorder %s25_s20, 4   ;;  %s1445_s16 = smov %s1075_s17 }
 0x1a5   : > { %s1446_s17 = smov %s1227_s8  ;;  %s1447_s18 = smov %s1083_s19 }
 0x1a6   : > { %s1448_s19 = smov %s1450_s29  ;;  %24 = sbr.rel (!%p22_p10) target bundleno = 11 (0xb), region = 110 }
 0x1ad   :  { %550 = vsyncpa [#allocation4], 1 }
 0x1ae   :  { %552 = vsyncpa [#allocation4 + $0x1], 1 }
 0x1af   :  { %553 = vsyncpa [#allocation7], 1 }
 0x1b0   :  { %554 = vsyncpa [#allocation5], 1 }
 0x1b1   :  { %556 = vsyncpa [#allocation5 + $0x1], 1 }
 0x1b2   :  { %557 = vsyncpa [#allocation10], 1 }
 0x1b3   :  { %559 = vsyncpa [#allocation10 + $0x1], 1 }

</bundles_post_ra>
